<compile_context>
chip_gen: v6e
topology: v6e:2x2x1
jax: 0.10.0
libtpu: 0.0.40
codegen_flags: <defaults>
</compile_context>

<pallas_src>
import math

import jax
import jax.numpy as jnp
from jax.experimental import pallas as pl
from jax.experimental.pallas import tpu as pltpu


NEG_SLOPE = 0.01  # PyTorch nn.LeakyReLU default


def _leaky_relu(v):
    return jnp.where(v > 0, v, NEG_SLOPE * v)


def _round_up(a, b):
    return (a + b - 1) // b * b


def _choose_row_tiling(m_sub, target, sublane):
    """Pick (tm, m_pad) with tm a multiple of `sublane`.

    Prefers an exact divisor of m_sub (=> no M padding, no output slicing),
    and among divisors prefers one giving an even, >1 tile count so the
    'parallel' grid axis can be sharded across v7x's two TensorCores.
    Falls back to padding only when exact divisors would be pathologically
    small (e.g. prime row counts).
    """
    target = max(sublane, _round_up(min(target, m_sub), sublane))
    divisors = [d for d in range(sublane, target + 1, sublane) if m_sub % d == 0]
    best = max(divisors) if divisors else sublane
    if best == m_sub or best * 4 >= target:
        tm = best
        n = m_sub // tm
        if n > 1 and n % 2 == 1:
            evens = [d for d in divisors if (m_sub // d) % 2 == 0]
            if evens:
                tm = max(evens)
        return tm, m_sub
    # Fallback: pad M up to a multiple of the target tile.
    return target, _round_up(m_sub, target)


def adapter_kernel(x_ref, w1t_ref, w2t_ref, h_ref, y_ref):
    # x_ref  : [TM, c_in_p]        per-grid-step row tile
    # w1t_ref: [c_in_p, bneck_p]   fc1.weight.T  (VMEM-resident across grid)
    # w2t_ref: [bneck_p, c_in_p]   fc2.weight.T  (VMEM-resident across grid)
    # h_ref  : [TM, bneck_p]       output tile: LeakyReLU(x @ w1.T)
    # y_ref  : [TM, c_in_p]        output tile: LeakyReLU(h @ w2.T)
    x = x_ref[...]

    # fc1: canonical (M,K)x(K,N) contraction on the MXU, f32 accumulate.
    h = jnp.dot(x, w1t_ref[...], preferred_element_type=jnp.float32)
    h = _leaky_relu(h)
    h_ref[...] = h.astype(h_ref.dtype)

    # fc2: reuse the live h (no VMEM round trip via h_ref).
    y = jnp.dot(h.astype(w2t_ref.dtype), w2t_ref[...],
                preferred_element_type=jnp.float32)
    y = _leaky_relu(y)
    y_ref[...] = y.astype(y_ref.dtype)


def clip_adapter_forward(x, w1, w2, *, tile_m=1024, use_bf16=False):
    """Fused ClipAdapter forward.

    x : [..., c_in]
    w1: [bottleneck, c_in]   (fc1.weight, PyTorch (out, in) layout)
    w2: [c_in, bottleneck]   (fc2.weight, PyTorch (out, in) layout)

    Returns (h, y):
      h = LeakyReLU(x @ w1.T)  -> [..., bottleneck]
      y = LeakyReLU(h @ w2.T)  -> [..., c_in]

    use_bf16=True casts operands to bf16 (f32 accumulation kept) — the main
    v5e bandwidth/MXU lever; outputs stay in x.dtype. Expect ~1e-2 error vs f32.
    """
    out_dtype = x.dtype
    c_in = x.shape[-1]
    bneck = w1.shape[0]
    assert w1.shape == (bneck, c_in)
    assert w2.shape == (c_in, bneck)

    lead = x.shape[:-1]
    M = math.prod(lead) if lead else 1

    # Degenerate empty-batch case: nothing to compute.
    if M == 0:
        return (jnp.zeros((*lead, bneck), dtype=out_dtype),
                jnp.zeros((*lead, c_in), dtype=out_dtype))

    in_dtype = jnp.bfloat16 if use_bf16 else x.dtype
    x2d = x.reshape(M, c_in).astype(in_dtype)
    # Pre-transpose the (tiny) weights once, outside the grid, so the kernel's
    # matmuls are canonical (M,K)x(K,N) with no per-iteration layout fixups.
    w1t = jnp.transpose(w1).astype(in_dtype)   # (c_in, bneck)
    w2t = jnp.transpose(w2).astype(in_dtype)   # (bneck, c_in)

    # ---- tiling: lane-dense feature dims, divisor-based row tiles -----------
    sublane = 16 if in_dtype == jnp.bfloat16 else 8
    c_in_p = _round_up(c_in, 128)
    bneck_p = _round_up(bneck, 128)
    m_sub = _round_up(M, sublane)

    tm, m_pad = _choose_row_tiling(m_sub, tile_m, sublane)
    grid_m = m_pad // tm

    # Pad only when actually needed (no-op for real CLIP feature sizes and
    # divisor-friendly M; padded contributions are zero and sliced off).
    if (m_pad, c_in_p) != (M, c_in):
        x2d = jnp.pad(x2d, ((0, m_pad - M), (0, c_in_p - c_in)))
    if (c_in_p, bneck_p) != (c_in, bneck):
        w1t = jnp.pad(w1t, ((0, c_in_p - c_in), (0, bneck_p - bneck)))
        w2t = jnp.pad(w2t, ((0, bneck_p - bneck), (0, c_in_p - c_in)))

    # ---- VMEM budget: double-buffered activation tiles + resident weights ---
    in_item = jnp.dtype(in_dtype).itemsize
    out_item = jnp.dtype(out_dtype).itemsize
    act_bytes = 2 * tm * (c_in_p * in_item + (bneck_p + c_in_p) * out_item)
    wgt_bytes = 2 * 2 * c_in_p * bneck_p * in_item   # assume 2 bufs per weight
    vmem_limit = act_bytes + wgt_bytes + (6 << 20)   # compiler scratch headroom
    vmem_limit = max(vmem_limit, 16 << 20)
    vmem_limit = min(vmem_limit, 56 << 20)           # headroom under v7x 64 MiB

    cost = pl.CostEstimate(
        flops=2 * 2 * m_pad * c_in_p * bneck_p,
        transcendentals=0,
        bytes_accessed=(m_pad * c_in_p * in_item                    # x
                        + m_pad * (bneck_p + c_in_p) * out_item     # h, y
                        + 2 * c_in_p * bneck_p * in_item),          # weights
    )

    h2d, y2d = pl.pallas_call(
        adapter_kernel,
        out_shape=(
            jax.ShapeDtypeStruct((m_pad, bneck_p), out_dtype),
            jax.ShapeDtypeStruct((m_pad, c_in_p), out_dtype),
        ),
        grid_spec=pltpu.PrefetchScalarGridSpec(
            num_scalar_prefetch=0,
            grid=(grid_m,),
            in_specs=[
                pl.BlockSpec((tm, c_in_p), lambda i: (i, 0)),        # x tile
                pl.BlockSpec((c_in_p, bneck_p), lambda i: (0, 0)),   # w1.T resident
                pl.BlockSpec((bneck_p, c_in_p), lambda i: (0, 0)),   # w2.T resident
            ],
            out_specs=[
                pl.BlockSpec((tm, bneck_p), lambda i: (i, 0)),       # h tile
                pl.BlockSpec((tm, c_in_p), lambda i: (i, 0)),        # y tile
            ],
        ),
        compiler_params=pltpu.CompilerParams(
            dimension_semantics=("parallel",),   # shard row tiles across TCs (v7x)
            vmem_limit_bytes=int(vmem_limit),
        ),
        cost_estimate=cost,
    )(x2d, w1t, w2t)

    # Slice / reshape only when padding actually happened.
    if (m_pad, bneck_p) != (M, bneck):
        h2d = h2d[:M, :bneck]
    if (m_pad, c_in_p) != (M, c_in):
        y2d = y2d[:M, :c_in]
    h = h2d.reshape(*lead, bneck)
    y = y2d.reshape(*lead, c_in)
    return h, y


def xavier_uniform(key, shape, dtype=jnp.float32):
    # PyTorch xavier_uniform_ for a Linear weight of shape (out, in):
    # bound = gain * sqrt(6 / (fan_in + fan_out))
    fan_out, fan_in = shape
    bound = (6.0 / (fan_in + fan_out)) ** 0.5
    return jax.random.uniform(key, shape, dtype=dtype, minval=-bound, maxval=bound)


if __name__ == "__main__":
    key = jax.random.PRNGKey(0)
    k_x, k_w1, k_w2 = jax.random.split(key, 3)

    # SMALL shapes: batch=2, seq=8, c_in=32, bottleneck=64
    batch, seq, c_in, bottleneck = 2, 8, 32, 64

    x = jax.random.normal(k_x, (batch, seq, c_in), dtype=jnp.float32)
    w1 = xavier_uniform(k_w1, (bottleneck, c_in))   # fc1.weight: (out, in)
    w2 = xavier_uniform(k_w2, (c_in, bottleneck))   # fc2.weight: (out, in)

    # f32 path (default): exact parity with the PyTorch module.
    h, y = clip_adapter_forward(x, w1, w2)
    jax.block_until_ready((h, y))

    h_ref = jax.nn.leaky_relu(x @ w1.T, NEG_SLOPE)
    y_ref = jax.nn.leaky_relu(h_ref @ w2.T, NEG_SLOPE)
    assert h.shape == (batch, seq, bottleneck)
    assert y.shape == (batch, seq, c_in)
    assert jnp.allclose(h, h_ref, atol=1e-5, rtol=1e-5)
    assert jnp.allclose(y, y_ref, atol=1e-5, rtol=1e-5)

    # bf16 operand path (v5e lever): relaxed tolerance, f32 accumulate kept.
    h_bf, y_bf = clip_adapter_forward(x, w1, w2, use_bf16=True)
    jax.block_until_ready((h_bf, y_bf))
    assert jnp.allclose(h_bf, h_ref, atol=2e-2, rtol=2e-2)
    assert jnp.allclose(y_bf, y_ref, atol=2e-2, rtol=2e-2)

    print("KERNEL_OK")
</pallas_src>

<mosaic_0001>
module attributes {stable_mosaic.version = 11 : i64} {
  func.func @adapter_kernel(%arg0: i32, %arg1: memref<16x128xf32, #tpu.memory_space<vmem>>, %arg2: memref<128x128xf32, #tpu.memory_space<vmem>>, %arg3: memref<128x128xf32, #tpu.memory_space<vmem>>, %arg4: memref<16x128xf32, #tpu.memory_space<vmem>>, %arg5: memref<16x128xf32, #tpu.memory_space<vmem>>) attributes {dimension_semantics = [#tpu.dimension_semantics<parallel>], iteration_bounds = array<i64: 1>, scalar_prefetch = 0 : i64, scratch_operands = 0 : i64, tpu.core_type = #tpu.core_type<tc>, window_params = [{transform_indices = @transform_0, window_bounds = array<i64: 16, 128>}, {pipeline_mode = #tpu.pipeline_mode<synchronous>, transform_indices = @transform_1, window_bounds = array<i64: 128, 128>}, {pipeline_mode = #tpu.pipeline_mode<synchronous>, transform_indices = @transform_2, window_bounds = array<i64: 128, 128>}, {transform_indices = @transform_3, window_bounds = array<i64: 16, 128>}, {transform_indices = @transform_4, window_bounds = array<i64: 16, 128>}]} {
    %c0 = arith.constant 0 : index
    %c0_0 = arith.constant 0 : index
    %0 = vector.load %arg1[%c0, %c0_0] : memref<16x128xf32, #tpu.memory_space<vmem>>, vector<16x128xf32>
    %c0_1 = arith.constant 0 : index
    %c0_2 = arith.constant 0 : index
    %1 = vector.load %arg2[%c0_1, %c0_2] : memref<128x128xf32, #tpu.memory_space<vmem>>, vector<128x128xf32>
    %cst = arith.constant dense<0.000000e+00> : vector<16x128xf32>
    %2 = tpu.matmul %0, %1, %cst {dimension_numbers = #tpu.dot_dimension_numbers<[1], [0], [0], [1], [0, 0, 1, 1], [], []>} : vector<16x128xf32>, vector<128x128xf32>, vector<16x128xf32> -> vector<16x128xf32>
    %cst_3 = arith.constant 0.000000e+00 : f32
    %3 = vector.broadcast %cst_3 : f32 to vector<16x128xf32>
    %4 = arith.cmpf ogt, %2, %3 : vector<16x128xf32>
    %cst_4 = arith.constant 0.00999999977 : f32
    %5 = vector.broadcast %cst_4 : f32 to vector<16x128xf32>
    %6 = arith.mulf %5, %2 : vector<16x128xf32>
    %7 = arith.select %4, %2, %6 : vector<16x128xi1>, vector<16x128xf32>
    %c0_5 = arith.constant 0 : index
    %c0_6 = arith.constant 0 : index
    %8 = vector.load %arg4[%c0_5, %c0_6] : memref<16x128xf32, #tpu.memory_space<vmem>>, vector<16x128xf32>
    tpu.vector_store %arg4[%c0_5, %c0_6], %7 {strides = array<i32>} : memref<16x128xf32, #tpu.memory_space<vmem>>, vector<16x128xf32>,
    %c0_7 = arith.constant 0 : index
    %c0_8 = arith.constant 0 : index
    %9 = vector.load %arg3[%c0_7, %c0_8] : memref<128x128xf32, #tpu.memory_space<vmem>>, vector<128x128xf32>
    %cst_9 = arith.constant dense<0.000000e+00> : vector<16x128xf32>
    %10 = tpu.matmul %7, %9, %cst_9 {dimension_numbers = #tpu.dot_dimension_numbers<[1], [0], [0], [1], [0, 0, 1, 1], [], []>} : vector<16x128xf32>, vector<128x128xf32>, vector<16x128xf32> -> vector<16x128xf32>
    %cst_10 = arith.constant 0.000000e+00 : f32
    %11 = vector.broadcast %cst_10 : f32 to vector<16x128xf32>
    %12 = arith.cmpf ogt, %10, %11 : vector<16x128xf32>
    %cst_11 = arith.constant 0.00999999977 : f32
    %13 = vector.broadcast %cst_11 : f32 to vector<16x128xf32>
    %14 = arith.mulf %13, %10 : vector<16x128xf32>
    %15 = arith.select %12, %10, %14 : vector<16x128xi1>, vector<16x128xf32>
    %c0_12 = arith.constant 0 : index
    %c0_13 = arith.constant 0 : index
    %16 = vector.load %arg5[%c0_12, %c0_13] : memref<16x128xf32, #tpu.memory_space<vmem>>, vector<16x128xf32>
    tpu.vector_store %arg5[%c0_12, %c0_13], %15 {strides = array<i32>} : memref<16x128xf32, #tpu.memory_space<vmem>>, vector<16x128xf32>,
    return
  }
  func.func @transform_0(%arg0: i32) -> (i32, i32) {
    %c0_i32 = arith.constant 0 : i32
    %c0_i32_0 = arith.constant 0 : i32
    return %arg0, %c0_i32 : i32, i32
  }
  func.func @transform_1(%arg0: i32) -> (i32, i32) {
    %c0_i32 = arith.constant 0 : i32
    %c0_i32_0 = arith.constant 0 : i32
    %c0_i32_1 = arith.constant 0 : i32
    return %c0_i32, %c0_i32_0 : i32, i32
  }
  func.func @transform_2(%arg0: i32) -> (i32, i32) {
    %c0_i32 = arith.constant 0 : i32
    %c0_i32_0 = arith.constant 0 : i32
    %c0_i32_1 = arith.constant 0 : i32
    return %c0_i32, %c0_i32_0 : i32, i32
  }
  func.func @transform_3(%arg0: i32) -> (i32, i32) {
    %c0_i32 = arith.constant 0 : i32
    %c0_i32_0 = arith.constant 0 : i32
    return %arg0, %c0_i32 : i32, i32
  }
  func.func @transform_4(%arg0: i32) -> (i32, i32) {
    %c0_i32 = arith.constant 0 : i32
    %c0_i32_0 = arith.constant 0 : i32
    return %arg0, %c0_i32 : i32, i32
  }
}

</mosaic_0001>

<bundles_post_ra>
// kernel: tpu_custom_call.1
= control target key start
LH: loop header
LB: loop body
LE: loop exit
PB: predicated region body
PF: predicated region fallthrough
CT: control target
= control target key end

     0   :  { %10 = vsyncpa [#allocation3], 0  ;;  %s576_s0 = inlined_call_operand.hbm [shape: f32[16,128], index: 0, kind: input, shape index: {}]   ;;  %s577_s1 = inlined_call_operand.hbm [shape: f32[128,128], index: 1, kind: input, shape index: {}]   ;;  %s578_s2 = inlined_call_operand.hbm [shape: f32[128,128], index: 2, kind: input, shape index: {}]   ;;  %s579_s3 = inlined_call_operand.hbm [shape: f32[16,128], index: 3, kind: output, shape index: {0}]   ;;  %s580_s4 = inlined_call_operand.hbm [shape: f32[16,128], index: 4, kind: output, shape index: {1}]  }
   0x1   :  { %11 = vsyncpa [#allocation6], 0 }
   0x2   :  { %12 = vsyncpa [#allocation4], 0 }
   0x3   :  { %13 = vsyncpa [#allocation10], 0  ;;  %s514_s15 = smov [#allocation5]   ;;  %s515_s17 = smov [#allocation2]  }
   0x4   :  { %s31_s16 = sshll.u32 %s514_s15, 4  ;;  %s19_s18 = sshll.u32 %s515_s17, 4  ;;  %s32_s16 = int_to_ptr.vmem [resolvable:$true] %s31_s16  ;;  %s20_s18 = int_to_ptr.vmem [resolvable:$true] %s19_s18 }
   0x5   :  { %s414_s19 = scalar_lea.vmem %s32_s16, 2048  ;;  %p419_p1 = scmp.lt.s32.totalorder %s32_s16, %s32_s16 }
   0x6   :  { %p415_p0 = scmp.ne.s32.totalorder %s32_s16, %s414_s19  ;;  %p420_p2 = scmp.lt.s32.totalorder %s414_s19, %s414_s19 }
   0x8   :  { %p421_p3 = por %p420_p2, %p419_p1 }
   0xa   :  { %p422_p4 = pnand %p421_p3, %p415_p0 }
   0xc   :  { %425 = shalt.err (!%p422_p4)
}
   0xd   :  { %s516_s20 = smov 128   ;;  %s517_s21 = smov 8  }
   0xe   :  { %37 = dma.hbm_to_vmem [thread:$0]  %s577_s1, 2048, %s32_s16, [#allocation6], %s516_s20, %s516_s20, %s517_s21  }
   0xf   :  { %s434_s24 = scalar_lea.vmem %s20_s18, 256  ;;  %p439_p6 = scmp.lt.s32.totalorder %s20_s18, %s20_s18 }
  0x10   :  { %p435_p5 = scmp.ne.s32.totalorder %s20_s18, %s434_s24  ;;  %p440_p7 = scmp.lt.s32.totalorder %s434_s24, %s434_s24 }
  0x12   :  { %p441_p8 = por %p440_p7, %p439_p6 }
  0x14   :  { %p442_p9 = pnand %p441_p8, %p435_p5 }
  0x16   :  { %445 = shalt.err (!%p442_p9)
}
  0x17   :  { %25 = dma.hbm_to_vmem [thread:$0]  %s576_s0, 256, %s20_s18, [#allocation3], %s516_s20, %s516_s20, %s517_s21  }
  0x18   :  { %s518_s27 = smov [#allocation7]  }
  0x19   :  { %s43_s28 = sshll.u32 %s518_s27, 4  ;;  %s44_s28 = int_to_ptr.vmem [resolvable:$true] %s43_s28 }
  0x1a   :  { %s454_s29 = scalar_lea.vmem %s44_s28, 2048  ;;  %p459_p11 = scmp.lt.s32.totalorder %s44_s28, %s44_s28 }
  0x1b   :  { %p455_p10 = scmp.ne.s32.totalorder %s44_s28, %s454_s29  ;;  %p460_p12 = scmp.lt.s32.totalorder %s454_s29, %s454_s29 }
  0x1d   :  { %p461_p13 = por %p460_p12, %p459_p11 }
  0x1f   :  { %p462_p0 = pnand %p461_p13, %p455_p10 }
  0x21   :  { %465 = shalt.err (!%p462_p0)
}
  0x22   :  { %49 = dma.hbm_to_vmem [thread:$0]  %s578_s2, 2048, %s44_s28, [#allocation6], %s516_s20, %s516_s20, %s517_s21  }
  0x23   :  { %506 = dma.done.wait [#allocation3], 256  }
  0x24   :  { %507 = vsyncadd [#allocation3], 4294967040 }
  0x25   :  { %508 = dma.done.wait [#allocation6], 4096  }
  0x26   :  { %509 = vsyncadd [#allocation6], 4294963200  ;;  %v76_v0 = vld [vmem:[#allocation5 + $0x78] sm:$0xff]  ;;  %v75_v1 = vld [vmem:[#allocation5 + $0x70] sm:$0xff]  ;;  %s519_s0 = smov [#allocation8]  }
  0x27   :  { %329 = vmatprep.subr.mxu0 %v76_v0  ;;  %v74_v2 = vld [vmem:[#allocation5 + $0x68] sm:$0xff]  ;;  %v73_v3 = vld [vmem:[#allocation5 + $0x60] sm:$0xff]  ;;  %v59_v4 = vld [vmem:[#allocation2] sm:$0xff]  ;;  %s264_s2 = sshll.u32 %s519_s0, 4  ;;  %s265_s2 = int_to_ptr.vmem [resolvable:$true] %s264_s2 }
  0x28   :  { %330 = vmatpush3.msra.mxu0 %v76_v0  ;;  %v72_v5 = vld [vmem:[#allocation5 + $0x58] sm:$0xff]  ;;  %361 = vmatprep.mubr.f32.mxu0 %v59_v4  ;;  %v174_v7 = vld [vmem:[#allocation7 + $0x70] sm:$0xff]  ;;  %v173_v9 = vld [vmem:[#allocation7 + $0x68] sm:$0xff]  ;;  %s466_s5 = scalar_lea.vmem %s265_s2, 256  ;;  %p471_p2 = scmp.lt.s32.totalorder %s265_s2, %s265_s2 }
  0x29   :  { %331 = vmatprep.subr.mxu0 %v75_v1  ;;  %v175_v6 = vld [vmem:[#allocation7 + $0x78] sm:$0xff]  ;;  %v71_v8 = vld [vmem:[#allocation5 + $0x50] sm:$0xff]  ;;  %v70_v10 = vld [vmem:[#allocation5 + $0x48] sm:$0xff]  ;;  %p467_p1 = scmp.ne.s32.totalorder %s265_s2, %s466_s5  ;;  %p472_p3 = scmp.lt.s32.totalorder %s466_s5, %s466_s5 }
  0x2a   :  { %332 = vmatpush3.msra.mxu0 %v75_v1  ;;  %364 = vmatprep.subr.mxu1 %v175_v6  ;;  %v172_v11 = vld [vmem:[#allocation7 + $0x60] sm:$0xff]  ;;  %v171_v13 = vld [vmem:[#allocation7 + $0x58] sm:$0xff]  ;;  %v170_v15 = vld [vmem:[#allocation7 + $0x50] sm:$0xff] }
  0x2b   :  { %333 = vmatprep.subr.mxu0 %v74_v2  ;;  %365 = vmatpush3.msra.mxu1 %v175_v6  ;;  %v69_v12 = vld [vmem:[#allocation5 + $0x40] sm:$0xff]  ;;  %v68_v14 = vld [vmem:[#allocation5 + $0x38] sm:$0xff]  ;;  %v67_v16 = vld [vmem:[#allocation5 + $0x30] sm:$0xff]  ;;  %p473_p4 = por %p472_p3, %p471_p2 }
  0x2c   :  { %334 = vmatpush3.msra.mxu0 %v74_v2  ;;  %366 = vmatprep.subr.mxu1 %v174_v7  ;;  %v169_v17 = vld [vmem:[#allocation7 + $0x48] sm:$0xff]  ;;  %v168_v19 = vld [vmem:[#allocation7 + $0x40] sm:$0xff]  ;;  %v167_v21 = vld [vmem:[#allocation7 + $0x38] sm:$0xff] }
  0x2d   :  { %335 = vmatprep.subr.mxu0 %v73_v3  ;;  %367 = vmatpush3.msra.mxu1 %v174_v7  ;;  %v66_v18 = vld [vmem:[#allocation5 + $0x28] sm:$0xff]  ;;  %v65_v20 = vld [vmem:[#allocation5 + $0x20] sm:$0xff]  ;;  %v64_v22 = vld [vmem:[#allocation5 + $0x18] sm:$0xff]  ;;  %p474_p5 = pnand %p473_p4, %p467_p1 }
  0x2e   :  { %336 = vmatpush3.msra.mxu0 %v73_v3  ;;  %368 = vmatprep.subr.mxu1 %v173_v9  ;;  %v166_v23 = vld [vmem:[#allocation7 + $0x30] sm:$0xff]  ;;  %v165_v25 = vld [vmem:[#allocation7 + $0x28] sm:$0xff]  ;;  %v164_v27 = vld [vmem:[#allocation7 + $0x20] sm:$0xff] }
  0x2f   :  { %337 = vmatprep.subr.mxu0 %v72_v5  ;;  %369 = vmatpush3.msra.mxu1 %v173_v9  ;;  %v63_v24 = vld [vmem:[#allocation5 + $0x10] sm:$0xff]  ;;  %v62_v26 = vld [vmem:[#allocation5 + $0x8] sm:$0xff]  ;;  %v61_v28 = vld [vmem:[#allocation5] sm:$0xff] }
  0x30   :  { %338 = vmatpush3.msra.mxu0 %v72_v5  ;;  %370 = vmatprep.subr.mxu1 %v172_v11  ;;  %v163_v29 = vld [vmem:[#allocation7 + $0x18] sm:$0xff]  ;;  %v162_v31 = vld [vmem:[#allocation7 + $0x10] sm:$0xff]  ;;  %v161_v32 = vld [vmem:[#allocation7 + $0x8] sm:$0xff] }
  0x31   :  { %339 = vmatprep.subr.mxu0 %v71_v8  ;;  %371 = vmatpush3.msra.mxu1 %v172_v11  ;;  %v60_v30 = vld [vmem:[#allocation2 + $0x8] sm:$0xff]  ;;  %v160_v33 = vld [vmem:[#allocation7] sm:$0xff] }
  0x32   :  { %340 = vmatpush3.msra.mxu0 %v71_v8  ;;  %372 = vmatprep.subr.mxu1 %v171_v13 }
  0x33   :  { %341 = vmatprep.subr.mxu0 %v70_v10  ;;  %373 = vmatpush3.msra.mxu1 %v171_v13 }
  0x34   :  { %342 = vmatpush3.msra.mxu0 %v70_v10  ;;  %374 = vmatprep.subr.mxu1 %v170_v15 }
  0x35   :  { %343 = vmatprep.subr.mxu0 %v69_v12  ;;  %375 = vmatpush3.msra.mxu1 %v170_v15 }
  0x36   :  { %344 = vmatpush3.msra.mxu0 %v69_v12  ;;  %376 = vmatprep.subr.mxu1 %v169_v17 }
  0x37   :  { %345 = vmatprep.subr.mxu0 %v68_v14  ;;  %377 = vmatpush3.msra.mxu1 %v169_v17 }
  0x38   :  { %346 = vmatpush3.msra.mxu0 %v68_v14  ;;  %378 = vmatprep.subr.mxu1 %v168_v19 }
  0x39   :  { %347 = vmatprep.subr.mxu0 %v67_v16  ;;  %379 = vmatpush3.msra.mxu1 %v168_v19 }
  0x3a   :  { %348 = vmatpush3.msra.mxu0 %v67_v16  ;;  %380 = vmatprep.subr.mxu1 %v167_v21 }
  0x3b   :  { %349 = vmatprep.subr.mxu0 %v66_v18  ;;  %381 = vmatpush3.msra.mxu1 %v167_v21 }
  0x3c   :  { %350 = vmatpush3.msra.mxu0 %v66_v18  ;;  %382 = vmatprep.subr.mxu1 %v166_v23 }
  0x3d   :  { %351 = vmatprep.subr.mxu0 %v65_v20  ;;  %383 = vmatpush3.msra.mxu1 %v166_v23 }
  0x3e   :  { %352 = vmatpush3.msra.mxu0 %v65_v20  ;;  %384 = vmatprep.subr.mxu1 %v165_v25 }
  0x3f   :  { %353 = vmatprep.subr.mxu0 %v64_v22  ;;  %385 = vmatpush3.msra.mxu1 %v165_v25 }
  0x40   :  { %354 = vmatpush3.msra.mxu0 %v64_v22  ;;  %386 = vmatprep.subr.mxu1 %v164_v27 }
  0x41   :  { %355 = vmatprep.subr.mxu0 %v63_v24  ;;  %387 = vmatpush3.msra.mxu1 %v164_v27 }
  0x42   :  { %356 = vmatpush3.msra.mxu0 %v63_v24  ;;  %388 = vmatprep.subr.mxu1 %v163_v29 }
  0x43   :  { %357 = vmatprep.subr.mxu0 %v62_v26  ;;  %389 = vmatpush3.msra.mxu1 %v163_v29 }
  0x44   :  { %358 = vmatpush3.msra.mxu0 %v62_v26  ;;  %390 = vmatprep.subr.mxu1 %v162_v31 }
  0x45   :  { %359 = vmatprep.subr.mxu0 %v61_v28  ;;  %391 = vmatpush3.msra.mxu1 %v162_v31 }
  0x46   :  { %360 = vmatpush3.msra.mxu0 %v61_v28  ;;  %392 = vmatprep.subr.mxu1 %v161_v32 }
  0x47   :  { %362 = vmatmul.mubr.f32.vlgmr.msra.gmra.mxu0 %v60_v30  ;;  %393 = vmatpush3.msra.mxu1 %v161_v32 }
  0x48   :  { %394 = vmatprep.subr.mxu1 %v160_v33 }
  0x49   :  { %395 = vmatpush3.msra.mxu1 %v160_v33 }
 0x107   :  { %v363_v34 = vpop.f32.mrf.mxu0 }
 0x108   :  { %vm153_vm0 = vcmp.gt.f32.partialorder %v363_v34, 0.0  ;;  %v155_v35 = vmul.f32 0.01, %v363_v34 }
 0x109   :  { %v143_v36 = vpop.f32.mrf.mxu0 }
 0x10a   :  { %vm152_vm1 = vcmp.gt.f32.partialorder %v143_v36, 0.0  ;;  %v154_v37 = vmul.f32 0.01, %v143_v36  ;;  %v157_v38 = vsel %vm153_vm0, %v363_v34, %v155_v35 }
 0x10b   :  { %159 = vst [vmem:[#allocation8 + $0x8] sm:$0xff] %v157_v38 }
 0x10c   :  { %v156_v39 = vsel %vm152_vm1, %v143_v36, %v154_v37 }
 0x10d   :  { %158 = vst [vmem:[#allocation8] sm:$0xff] %v156_v39  ;;  %396 = vmatprep.mubr.f32.mxu1 %v156_v39 }
 0x10e   :  { %397 = vmatmul.mubr.f32.vlgmr.msra.gmra.mxu1 %v157_v38 }
 0x10f   :  { %477 = shalt.err (!%p474_p5)
}
 0x110   :  { %270 = dma.vmem_to_hbm [thread:$0]  %s265_s2, 256, %s579_s3, [#allocation4], %s516_s20, %s516_s20, %s517_s21  }
 0x111   :  { %s520_s8 = smov [#allocation9]  }
 0x112   :  { %s276_s9 = sshll.u32 %s520_s8, 4  ;;  %s277_s9 = int_to_ptr.vmem [resolvable:$true] %s276_s9 }
 0x113   :  { %s486_s10 = scalar_lea.vmem %s277_s9, 256  ;;  %p491_p7 = scmp.lt.s32.totalorder %s277_s9, %s277_s9 }
 0x114   :  { %p487_p6 = scmp.ne.s32.totalorder %s277_s9, %s486_s10  ;;  %p492_p8 = scmp.lt.s32.totalorder %s486_s10, %s486_s10 }
 0x116   :  { %p493_p9 = por %p492_p8, %p491_p7 }
 0x118   :  { %p494_p10 = pnand %p493_p9, %p487_p6 }
 0x1ce   :  { %v398_v40 = vpop.f32.mrf.mxu1 }
 0x1cf   :  { %vm252_vm2 = vcmp.gt.f32.partialorder %v398_v40, 0.0  ;;  %v254_v41 = vmul.f32 0.01, %v398_v40 }
 0x1d0   :  { %v242_v42 = vpop.f32.mrf.mxu1 }
 0x1d1   :  { %v256_v43 = vsel %vm252_vm2, %v398_v40, %v254_v41  ;;  %vm251_vm3 = vcmp.gt.f32.partialorder %v242_v42, 0.0  ;;  %v253_v44 = vmul.f32 0.01, %v242_v42 }
 0x1d2   :  { %258 = vst [vmem:[#allocation9 + $0x8] sm:$0xff] %v256_v43 }
 0x1d3   :  { %v255_v45 = vsel %vm251_vm3, %v242_v42, %v253_v44 }
 0x1d4   :  { %257 = vst [vmem:[#allocation9] sm:$0xff] %v255_v45 }
 0x1d5   :  { %497 = shalt.err (!%p494_p10)
}
 0x1d6   :  { %282 = dma.vmem_to_hbm [thread:$0]  %s277_s9, 256, %s580_s4, [#allocation10], %s516_s20, %s516_s20, %s517_s21  }
 0x1d7   :  { %510 = dma.done.wait [#allocation4], 256  }
 0x1d8   :  { %511 = vsyncadd [#allocation4], 4294967040 }
 0x1d9   :  { %512 = dma.done.wait [#allocation10], 256  }
 0x1da   :  { %513 = vsyncadd [#allocation10], 4294967040 }
 0x1db   :  { %289 = vsyncpa [#allocation3], 1 }
 0x1dc   :  { %290 = vsyncpa [#allocation6], 1 }
 0x1dd   :  { %291 = vsyncpa [#allocation4], 1 }
 0x1de   :  { %292 = vsyncpa [#allocation10], 1 }

</bundles_post_ra>
